<compile_context>
chip_gen: v5e
topology: v5e:2x2
jax: 0.10.0
libtpu: 0.0.40
codegen_flags: <defaults>
</compile_context>

<pallas_src>
import jax
import jax.numpy as jnp
from jax import lax
from jax.experimental import pallas as pl
from jax.experimental.pallas import tpu as pltpu


def _round_up(x, m):
    return ((x + m - 1) // m) * m


def _choose_tile(dim, max_tile, align):
    """Largest tile <= max_tile that is a multiple of `align` and evenly divides
    dim rounded up to `align` (so no padding beyond alignment is needed)."""
    dim_pad = _round_up(dim, align)
    t = min(_round_up(max_tile, align), dim_pad)
    while dim_pad % t != 0:
        t -= align
    return t, dim_pad


# --------------------------------------------------------------------------- #
# Kernels
# --------------------------------------------------------------------------- #
def _leaky_relu(x, neg_slope=0.2):
    return jnp.where(x > 0, x, neg_slope * x)


def _kernel_acc_in_out(x_ref, w_ref, b_ref, inv_sigma_ref, nlin_ref, out_ref):
    """f32-output variant: accumulate directly into out_ref (resident over K),
    no VMEM scratch.  Epilogue fuses spectral-norm scale + bias + LeakyReLU."""
    k = pl.program_id(2)

    @pl.when(k == 0)
    def _():
        out_ref[...] = jnp.zeros_like(out_ref)

    # Contract over IN directly on the MXU — no in-kernel transpose of w.
    out_ref[...] += lax.dot_general(
        x_ref[...], w_ref[...],
        dimension_numbers=(((1,), (1,)), ((), ())),
        preferred_element_type=jnp.float32)

    @pl.when(k == pl.num_programs(2) - 1)
    def _():
        inv_sigma = inv_sigma_ref[0]                      # SMEM scalar
        out = out_ref[...] * inv_sigma + b_ref[...]       # fused scale + bias
        out_ref[...] = out
        nlin_ref[...] = _leaky_relu(out)


def _kernel_acc_scratch(x_ref, w_ref, b_ref, inv_sigma_ref, nlin_ref, out_ref,
                        acc_ref):
    """General variant (non-f32 outputs): f32 VMEM accumulator, cast in the
    epilogue so the HBM writeback stays in the caller's (narrow) dtype."""
    k = pl.program_id(2)

    @pl.when(k == 0)
    def _():
        acc_ref[...] = jnp.zeros_like(acc_ref)

    acc_ref[...] += lax.dot_general(
        x_ref[...], w_ref[...],
        dimension_numbers=(((1,), (1,)), ((), ())),
        preferred_element_type=jnp.float32)

    @pl.when(k == pl.num_programs(2) - 1)
    def _():
        inv_sigma = inv_sigma_ref[0]
        out = acc_ref[...] * inv_sigma + b_ref[...]
        out_ref[...] = out.astype(out_ref.dtype)
        nlin_ref[...] = _leaky_relu(out).astype(nlin_ref.dtype)


# --------------------------------------------------------------------------- #
# Wrapper
# --------------------------------------------------------------------------- #
def linear_module_forward(x, w, b, u, *, block_m=512, block_n=256,
                          block_k=1024, use_bf16_matmul=None):
    """Pallas-backed forward of LinearModule.

    Args:
      x: (B, IN) input.
      w: (OUT, IN) Linear weight (un-normalized).
      b: (OUT,) Linear bias.
      u: (OUT,) power-iteration left singular vector estimate.
      use_bf16_matmul: None (auto: bf16 when x and w are bf16), True, or False.

    Returns:
      (nlin_out, out): both (B, OUT) in x.dtype, matching the PyTorch tuple.
    """
    B, IN = x.shape
    OUT = w.shape[0]
    out_dtype = x.dtype

    # --- spectral norm: one power-iteration step (plain JAX glue) ------------
    # sigma = ||w @ v|| (== u_new . (w @ v)), which avoids a third matvec.
    # Matvecs run in w's native dtype with f32 accumulation; no f32 copy of w.
    eps = 1e-12
    u_c = u.astype(w.dtype)
    v = lax.dot_general(w, u_c, (((0,), (0,)), ((), ())),
                        preferred_element_type=jnp.float32)          # w.T @ u
    v = v / jnp.maximum(jnp.linalg.norm(v), eps)                      # F.normalize
    wv = lax.dot_general(w, v.astype(w.dtype), (((1,), (0,)), ((), ())),
                         preferred_element_type=jnp.float32)          # w @ v
    sigma = jnp.linalg.norm(wv)
    inv_sigma = jnp.reshape(1.0 / jnp.maximum(sigma, eps), (1,)).astype(jnp.float32)

    # --- MXU operand dtype ----------------------------------------------------
    if use_bf16_matmul is None:
        use_bf16_matmul = (x.dtype == jnp.bfloat16 and w.dtype == jnp.bfloat16)
    mm_dtype = jnp.bfloat16 if use_bf16_matmul else jnp.promote_types(x.dtype, w.dtype)

    # --- tile sizing (tiles divide the aligned dims: no extra padding) -------
    TM, B_pad = _choose_tile(B, block_m, 8)       # batch padded only to 8
    TN, OUT_pad = _choose_tile(OUT, block_n, 128)
    TK, IN_pad = _choose_tile(IN, block_k, 128)

    # v7x megacore: make sure the "parallel" axes expose >= 2 blocks.
    if (B_pad // TM) * (OUT_pad // TN) < 2:
        if TM % 16 == 0:
            TM //= 2
        elif TN % 256 == 0:
            TN //= 2

    grid = (B_pad // TM, OUT_pad // TN, IN_pad // TK)

    x_p = x.astype(mm_dtype)
    if B_pad != B or IN_pad != IN:
        x_p = jnp.pad(x_p, ((0, B_pad - B), (0, IN_pad - IN)))
    w_p = w.astype(mm_dtype)
    if OUT_pad != OUT or IN_pad != IN:
        # Only hit when OUT/IN are not 128-multiples (tiny layers); aligned
        # layers feed the weight straight from HBM with no extra copy.
        w_p = jnp.pad(w_p, ((0, OUT_pad - OUT), (0, IN_pad - IN)))
    b_p = b.astype(jnp.float32)
    if OUT_pad != OUT:
        b_p = jnp.pad(b_p, (0, OUT_pad - OUT))
    b_p = b_p.reshape(1, OUT_pad)

    accumulate_in_output = (out_dtype == jnp.float32)
    kernel = _kernel_acc_in_out if accumulate_in_output else _kernel_acc_scratch
    scratch_shapes = ([] if accumulate_in_output
                      else [pltpu.VMEM((TM, TN), jnp.float32)])

    # VMEM working-set estimate (double-buffered inputs/outputs + scratch);
    # only raise the scoped limit when the defaults would be exceeded, and
    # keep well under v7x's 64 MiB per-core VMEM.
    in_bytes = jnp.dtype(mm_dtype).itemsize
    out_bytes = jnp.dtype(out_dtype).itemsize
    est = (2 * (TM * TK + TN * TK) * in_bytes       # x / w tiles, double-buffered
           + 2 * 2 * TM * TN * out_bytes            # two outputs, double-buffered
           + (0 if accumulate_in_output else TM * TN * 4))
    cp_kwargs = dict(dimension_semantics=("parallel", "parallel", "arbitrary"))
    if est > 24 * 1024 * 1024:
        cp_kwargs["vmem_limit_bytes"] = min(int(est * 3 // 2), 56 * 1024 * 1024)

    nlin_out, out = pl.pallas_call(
        kernel,
        out_shape=(
            jax.ShapeDtypeStruct((B_pad, OUT_pad), out_dtype),
            jax.ShapeDtypeStruct((B_pad, OUT_pad), out_dtype),
        ),
        grid_spec=pltpu.PrefetchScalarGridSpec(
            num_scalar_prefetch=0,
            grid=grid,
            in_specs=[
                pl.BlockSpec((TM, TK), lambda i, j, k: (i, k)),   # x tile
                pl.BlockSpec((TN, TK), lambda i, j, k: (j, k)),   # weight tile
                pl.BlockSpec((1, TN), lambda i, j, k: (0, j)),    # bias row (f32)
                pl.BlockSpec(memory_space=pltpu.SMEM),            # inv_sigma scalar
            ],
            out_specs=[
                pl.BlockSpec((TM, TN), lambda i, j, k: (i, j)),   # nlin(out)
                pl.BlockSpec((TM, TN), lambda i, j, k: (i, j)),   # out
            ],
            scratch_shapes=scratch_shapes,
        ),
        compiler_params=pltpu.CompilerParams(**cp_kwargs),
    )(x_p, w_p, b_p, inv_sigma)

    if B_pad != B or OUT_pad != OUT:
        nlin_out = nlin_out[:B, :OUT]
        out = out[:B, :OUT]
    return nlin_out, out


if __name__ == "__main__":
    # Small shapes consistent with nn.Linear(in_features=32, out_features=32)
    B, IN, OUT = 8, 32, 32

    key = jax.random.PRNGKey(0)
    kx, kw, kb, ku = jax.random.split(key, 4)

    x = jax.random.normal(kx, (B, IN), dtype=jnp.float32)
    # Deterministic parameter init (mimics Linear's uniform(-1/sqrt(IN), 1/sqrt(IN)))
    bound = 1.0 / jnp.sqrt(IN)
    w = jax.random.uniform(kw, (OUT, IN), minval=-bound, maxval=bound,
                           dtype=jnp.float32)
    b = jax.random.uniform(kb, (OUT,), minval=-bound, maxval=bound,
                           dtype=jnp.float32)
    u = jax.random.normal(ku, (OUT,), dtype=jnp.float32)
    u = u / (jnp.linalg.norm(u) + 1e-12)

    # ---- f32 path (accumulates in the output ref, no scratch) ---------------
    nlin_out, out = linear_module_forward(x, w, b, u)
    jax.block_until_ready((nlin_out, out))

    # Pure-JAX reference
    eps = 1e-12
    v = w.T @ u
    v = v / jnp.maximum(jnp.linalg.norm(v), eps)
    sigma = jnp.linalg.norm(w @ v)
    out_ref = x @ (w / sigma).T + b
    nlin_ref = jnp.where(out_ref > 0, out_ref, 0.2 * out_ref)
    assert out.dtype == jnp.float32
    assert jnp.allclose(out, out_ref, atol=1e-5, rtol=1e-5)
    assert jnp.allclose(nlin_out, nlin_ref, atol=1e-5, rtol=1e-5)

    # ---- bf16 path (bf16 MXU operands, f32 accumulation, bf16 outputs) ------
    nlin_bf, out_bf = linear_module_forward(
        x.astype(jnp.bfloat16), w.astype(jnp.bfloat16),
        b.astype(jnp.bfloat16), u.astype(jnp.bfloat16))
    jax.block_until_ready((nlin_bf, out_bf))
    assert out_bf.dtype == jnp.bfloat16 and nlin_bf.dtype == jnp.bfloat16
    assert jnp.allclose(out_bf.astype(jnp.float32), out_ref, atol=3e-2, rtol=3e-2)
    assert jnp.allclose(nlin_bf.astype(jnp.float32), nlin_ref, atol=3e-2, rtol=3e-2)

    print("KERNEL_OK")
</pallas_src>

<mosaic_0001>
module attributes {stable_mosaic.version = 11 : i64} {
  func.func @_kernel_acc_in_out(%arg0: i32, %arg1: i32, %arg2: i32, %arg3: memref<8x128xf32, #tpu.memory_space<vmem>>, %arg4: memref<128x128xf32, #tpu.memory_space<vmem>>, %arg5: memref<1x128xf32, #tpu.memory_space<vmem>>, %arg6: memref<1xf32, #tpu.memory_space<smem>>, %arg7: memref<8x128xf32, #tpu.memory_space<vmem>>, %arg8: memref<8x128xf32, #tpu.memory_space<vmem>>) attributes {dimension_semantics = [#tpu.dimension_semantics<parallel>, #tpu.dimension_semantics<parallel>, #tpu.dimension_semantics<arbitrary>], iteration_bounds = array<i64: 1, 1, 1>, scalar_prefetch = 0 : i64, scratch_operands = 0 : i64, tpu.core_type = #tpu.core_type<tc>, window_params = [{transform_indices = @transform_0, window_bounds = array<i64: 8, 128>}, {transform_indices = @transform_1, window_bounds = array<i64: 128, 128>}, {transform_indices = @transform_2, window_bounds = array<i64: 1, 128>}, {transform_indices = @transform_3, window_bounds = array<i64: 1>}, {transform_indices = @transform_4, window_bounds = array<i64: 8, 128>}, {transform_indices = @transform_5, window_bounds = array<i64: 8, 128>}]} {
    %c0_i32 = arith.constant 0 : i32
    %0 = arith.cmpi eq, %arg2, %c0_i32 : i32
    %1 = arith.extui %0 : i1 to i32
    %c0_i32_0 = arith.constant 0 : i32
    %2 = arith.cmpi ne, %1, %c0_i32_0 : i32
    scf.if %2 {
      %cst_10 = arith.constant 0.000000e+00 : f32
      %12 = vector.broadcast %cst_10 : f32 to vector<8x128xf32>
      %c0_11 = arith.constant 0 : index
      %c0_12 = arith.constant 0 : index
      %13 = vector.load %arg8[%c0_11, %c0_12] : memref<8x128xf32, #tpu.memory_space<vmem>>, vector<8x128xf32>
      tpu.vector_store %arg8[%c0_11, %c0_12], %12 {strides = array<i32>} : memref<8x128xf32, #tpu.memory_space<vmem>>, vector<8x128xf32>,
    } else {
    }
    %c0 = arith.constant 0 : index
    %c0_1 = arith.constant 0 : index
    %3 = vector.load %arg8[%c0, %c0_1] : memref<8x128xf32, #tpu.memory_space<vmem>>, vector<8x128xf32>
    %c0_2 = arith.constant 0 : index
    %c0_3 = arith.constant 0 : index
    %4 = vector.load %arg3[%c0_2, %c0_3] : memref<8x128xf32, #tpu.memory_space<vmem>>, vector<8x128xf32>
    %c0_4 = arith.constant 0 : index
    %c0_5 = arith.constant 0 : index
    %5 = vector.load %arg4[%c0_4, %c0_5] : memref<128x128xf32, #tpu.memory_space<vmem>>, vector<128x128xf32>
    %cst = arith.constant dense<0.000000e+00> : vector<8x128xf32>
    %6 = tpu.matmul %4, %5, %cst {dimension_numbers = #tpu.dot_dimension_numbers<[1], [1], [0], [0], [0, 0, 1, 0], [], []>} : vector<8x128xf32>, vector<128x128xf32>, vector<8x128xf32> -> vector<8x128xf32>
    %7 = arith.addf %3, %6 : vector<8x128xf32>
    %c0_6 = arith.constant 0 : index
    %c0_7 = arith.constant 0 : index
    %8 = vector.load %arg8[%c0_6, %c0_7] : memref<8x128xf32, #tpu.memory_space<vmem>>, vector<8x128xf32>
    tpu.vector_store %arg8[%c0_6, %c0_7], %7 {strides = array<i32>} : memref<8x128xf32, #tpu.memory_space<vmem>>, vector<8x128xf32>,
    %c0_i32_8 = arith.constant 0 : i32
    %9 = arith.cmpi eq, %arg2, %c0_i32_8 : i32
    %10 = arith.extui %9 : i1 to i32
    %c0_i32_9 = arith.constant 0 : i32
    %11 = arith.cmpi ne, %10, %c0_i32_9 : i32
    scf.if %11 {
      %c0_10 = arith.constant 0 : index
      %12 = memref.load %arg6[%c0_10] : memref<1xf32, #tpu.memory_space<smem>>
      %c0_11 = arith.constant 0 : index
      %c0_12 = arith.constant 0 : index
      %13 = vector.load %arg8[%c0_11, %c0_12] : memref<8x128xf32, #tpu.memory_space<vmem>>, vector<8x128xf32>
      %14 = vector.broadcast %12 : f32 to vector<8x128xf32>
      %15 = arith.mulf %13, %14 : vector<8x128xf32>
      %c0_13 = arith.constant 0 : index
      %c0_14 = arith.constant 0 : index
      %16 = vector.load %arg5[%c0_13, %c0_14] : memref<1x128xf32, #tpu.memory_space<vmem>>, vector<1x128xf32>
      %17 = vector.broadcast %16 : vector<1x128xf32> to vector<8x128xf32>
      %18 = arith.addf %15, %17 : vector<8x128xf32>
      %c0_15 = arith.constant 0 : index
      %c0_16 = arith.constant 0 : index
      %19 = vector.load %arg8[%c0_15, %c0_16] : memref<8x128xf32, #tpu.memory_space<vmem>>, vector<8x128xf32>
      tpu.vector_store %arg8[%c0_15, %c0_16], %18 {strides = array<i32>} : memref<8x128xf32, #tpu.memory_space<vmem>>, vector<8x128xf32>,
      %cst_17 = arith.constant 0.000000e+00 : f32
      %20 = vector.broadcast %cst_17 : f32 to vector<8x128xf32>
      %21 = arith.cmpf ogt, %18, %20 : vector<8x128xf32>
      %cst_18 = arith.constant 2.000000e-01 : f32
      %22 = vector.broadcast %cst_18 : f32 to vector<8x128xf32>
      %23 = arith.mulf %22, %18 : vector<8x128xf32>
      %24 = arith.select %21, %18, %23 : vector<8x128xi1>, vector<8x128xf32>
      %c0_19 = arith.constant 0 : index
      %c0_20 = arith.constant 0 : index
      %25 = vector.load %arg7[%c0_19, %c0_20] : memref<8x128xf32, #tpu.memory_space<vmem>>, vector<8x128xf32>
      tpu.vector_store %arg7[%c0_19, %c0_20], %24 {strides = array<i32>} : memref<8x128xf32, #tpu.memory_space<vmem>>, vector<8x128xf32>,
    } else {
    }
    return
  }
  func.func @transform_0(%arg0: i32, %arg1: i32, %arg2: i32) -> (i32, i32) {
    %c0_i32 = arith.constant 0 : i32
    return %arg0, %arg2 : i32, i32
  }
  func.func @transform_1(%arg0: i32, %arg1: i32, %arg2: i32) -> (i32, i32) {
    %c0_i32 = arith.constant 0 : i32
    return %arg1, %arg2 : i32, i32
  }
  func.func @transform_2(%arg0: i32, %arg1: i32, %arg2: i32) -> (i32, i32) {
    %c0_i32 = arith.constant 0 : i32
    %c0_i32_0 = arith.constant 0 : i32
    return %c0_i32, %arg1 : i32, i32
  }
  func.func @transform_3(%arg0: i32, %arg1: i32, %arg2: i32) -> i32 {
    %c0_i32 = arith.constant 0 : i32
    %c0_i32_0 = arith.constant 0 : i32
    return %c0_i32 : i32
  }
  func.func @transform_4(%arg0: i32, %arg1: i32, %arg2: i32) -> (i32, i32) {
    %c0_i32 = arith.constant 0 : i32
    return %arg0, %arg1 : i32, i32
  }
  func.func @transform_5(%arg0: i32, %arg1: i32, %arg2: i32) -> (i32, i32) {
    %c0_i32 = arith.constant 0 : i32
    return %arg0, %arg1 : i32, i32
  }
}

</mosaic_0001>

<bundles_post_ra>
// kernel: tpu_custom_call.1
= control target key start
LH: loop header
LB: loop body
LE: loop exit
PB: predicated region body
PF: predicated region fallthrough
CT: control target
= control target key end

     0   :  { %12 = vsyncpa [#allocation4], 0  ;;  %s314_s0 = inlined_call_operand.hbm [shape: f32[8,128], index: 0, kind: input, shape index: {}]   ;;  %s315_s1 = inlined_call_operand.hbm [shape: f32[128,128], index: 1, kind: input, shape index: {}]   ;;  %s316_s2 = inlined_call_operand.vmem [shape: f32[1,128], index: 2, kind: input, shape index: {}]   ;;  %s317_s3 = inlined_call_operand.<no memory space> [shape: f32[1], index: 3, kind: input, shape index: {}]   ;;  %s318_s4 = inlined_call_operand.hbm [shape: f32[8,128], index: 4, kind: output, shape index: {0}]   ;;  %s319_s5 = inlined_call_operand.hbm [shape: f32[8,128], index: 5, kind: output, shape index: {1}]  }
   0x1   :  { %13 = vsyncpa [#allocation7], 0 }
   0x2   :  { %14 = vsyncpa [#allocation5], 0 }
   0x3   :  { %15 = vsyncpa [#allocation10], 0  ;;  %s21_s20 = sshll.u32 %s314_s0, 4  ;;  %s260_s21 = smov [#allocation3]   ;;  %s22_s20 = int_to_ptr.hbm [resolvable:$true] %s21_s20 }
   0x4   :  { %s23_s22 = sshll.u32 %s260_s21, 4  ;;  %s31_s25 = sshll.u32 %s315_s1, 4  ;;  %s24_s22 = int_to_ptr.vmem [resolvable:$true] %s23_s22  ;;  %s32_s25 = int_to_ptr.hbm [resolvable:$true] %s31_s25 }
   0x5   :  { %26 = dma.hbm_to_vmem [thread:$0]  %s22_s20, 128, %s24_s22, [#allocation4]  }
   0x6   :  { %s261_s26 = smov [#allocation6]   ;;  %s262_s28 = smov 128  }
   0x7   :  { %s33_s27 = sshll.u32 %s261_s26, 4  ;;  %s263_s29 = smov 8   ;;  %s34_s27 = int_to_ptr.vmem [resolvable:$true] %s33_s27 }
   0x8   :  { %39 = dma.hbm_to_vmem [thread:$0]  %s32_s25, 2048, %s34_s27, [#allocation7], %s262_s28, %s262_s28, %s263_s29  }
   0x9   :  { %252 = dma.done.wait [#allocation4], 128  }
   0xa   :  { %253 = vsyncadd [#allocation4], 4294967168 }
   0xb   :  { %254 = dma.done.wait [#allocation7], 2048  }
   0xc   :  { %255 = vsyncadd [#allocation7], 4294965248  ;;  %v74_v0 = vld [vmem:[#allocation6 + $0x78] sm:$0xff]  ;;  %v73_v1 = vld [vmem:[#allocation6 + $0x70] sm:$0xff]  ;;  %v102_v18 = vstv %s317_s3  ;;  %s264_s7 = smov [#allocation9]   ;;  %s132_s11 = sshll.u32 %s319_s5, 4  ;;  %s133_s11 = int_to_ptr.hbm [resolvable:$true] %s132_s11 }
   0xd   :  { %75 = vmatpush.xpose.msra.mxu0 %v74_v0  ;;  %v72_v2 = vld [vmem:[#allocation6 + $0x68] sm:$0xff]  ;;  %v71_v3 = vld [vmem:[#allocation6 + $0x60] sm:$0xff]  ;;  %v70_v4 = vld [vmem:[#allocation6 + $0x58] sm:$0xff]  ;;  %s130_s8 = sshll.u32 %s264_s7, 4  ;;  %s265_s12 = smov [#allocation8]   ;;  %s131_s8 = int_to_ptr.vmem [resolvable:$true] %s130_s8 }
   0xe   :  { %v69_v5 = vld [vmem:[#allocation6 + $0x50] sm:$0xff]  ;;  %v68_v6 = vld [vmem:[#allocation6 + $0x48] sm:$0xff]  ;;  %v67_v7 = vld [vmem:[#allocation6 + $0x40] sm:$0xff]  ;;  %s119_s13 = sshll.u32 %s265_s12, 4  ;;  %s121_s16 = sshll.u32 %s318_s4, 4  ;;  %s120_s13 = int_to_ptr.vmem [resolvable:$true] %s119_s13  ;;  %s122_s16 = int_to_ptr.hbm [resolvable:$true] %s121_s16 }
   0xf   :  { %v66_v8 = vld [vmem:[#allocation6 + $0x38] sm:$0xff]  ;;  %v65_v9 = vld [vmem:[#allocation6 + $0x30] sm:$0xff]  ;;  %v64_v10 = vld [vmem:[#allocation6 + $0x28] sm:$0xff] }
  0x10   :  { %v63_v11 = vld [vmem:[#allocation6 + $0x20] sm:$0xff]  ;;  %v62_v12 = vld [vmem:[#allocation6 + $0x18] sm:$0xff]  ;;  %v61_v13 = vld [vmem:[#allocation6 + $0x10] sm:$0xff] }
  0x11   :  { %76 = vmatpush.xpose.msra.mxu0 %v73_v1  ;;  %v60_v14 = vld [vmem:[#allocation6 + $0x8] sm:$0xff]  ;;  %v59_v15 = vld [vmem:[#allocation6] sm:$0xff]  ;;  %v58_v16 = vld [vmem:[#allocation3] sm:$0xff] }
  0x12   :  { %v155_v19 = vld [vmem:[%s316_s2] ss:$0 sm:$0xff] }
  0x15   :  { %77 = vmatpush.xpose.msra.mxu0 %v72_v2 }
  0x19   :  { %78 = vmatpush.xpose.msra.mxu0 %v71_v3 }
  0x1d   :  { %79 = vmatpush.xpose.msra.mxu0 %v70_v4 }
  0x21   :  { %80 = vmatpush.xpose.msra.mxu0 %v69_v5 }
  0x25   :  { %81 = vmatpush.xpose.msra.mxu0 %v68_v6 }
  0x29   :  { %82 = vmatpush.xpose.msra.mxu0 %v67_v7 }
  0x2d   :  { %83 = vmatpush.xpose.msra.mxu0 %v66_v8 }
  0x31   :  { %84 = vmatpush.xpose.msra.mxu0 %v65_v9 }
  0x35   :  { %85 = vmatpush.xpose.msra.mxu0 %v64_v10 }
  0x39   :  { %86 = vmatpush.xpose.msra.mxu0 %v63_v11 }
  0x3d   :  { %87 = vmatpush.xpose.msra.mxu0 %v62_v12 }
  0x41   :  { %88 = vmatpush.xpose.msra.mxu0 %v61_v13 }
  0x45   :  { %89 = vmatpush.xpose.msra.mxu0 %v60_v14 }
  0x49   :  { %90 = vmatpush.xpose.msra.mxu0 %v59_v15 }
  0x4c   :  { %91 = vmatmul.f32.vlgmr.msra.gmra.mxu0 %v58_v16 }
  0xc9   :  { %v92_v17 = vpop.f32.mrf.mxu0 }
  0xca   :  { %v103_v20 = vmul.f32 %v102_v18, %v92_v17 }
  0xcc   :  { %v108_v21 = vadd.f32 %v155_v19, %v103_v20 }
  0xce   :  { %vm110_vm0 = vcmp.gt.f32.partialorder %v108_v21, 0.0  ;;  %v111_v22 = vmul.f32 0.2, %v108_v21  ;;  %109 = vst [vmem:[#allocation9] sm:$0xff] %v108_v21 }
  0xcf   :  { %135 = dma.vmem_to_hbm [thread:$0]  %s131_s8, 128, %s133_s11, [#allocation10]  }
  0xd0   :  { %v112_v23 = vsel %vm110_vm0, %v108_v21, %v111_v22 }
  0xd1   :  { %113 = vst [vmem:[#allocation8] sm:$0xff] %v112_v23 }
  0xd2   :  { %124 = dma.vmem_to_hbm [thread:$0]  %s120_s13, 128, %s122_s16, [#allocation5]  }
  0xd3   :  { %256 = dma.done.wait [#allocation5], 128  }
  0xd4   :  { %257 = vsyncadd [#allocation5], 4294967168 }
  0xd5   :  { %258 = dma.done.wait [#allocation10], 128  }
  0xd6   :  { %259 = vsyncadd [#allocation10], 4294967168 }
  0xd7   :  { %144 = vsyncpa [#allocation4], 1 }
  0xd8   :  { %145 = vsyncpa [#allocation7], 1 }
  0xd9   :  { %146 = vsyncpa [#allocation5], 1 }
  0xda   :  { %147 = vsyncpa [#allocation10], 1 }

</bundles_post_ra>
